<compile_context>
chip_gen: v6e
topology: v6e:2x2x1
jax: 0.10.0
libtpu: 0.0.40
codegen_flags: <defaults>
</compile_context>

<pallas_src>
import functools

import jax
import jax.numpy as jnp
from jax.experimental import pallas as pl
from jax.experimental.pallas import tpu as pltpu


HALO = 3          # 1 pixel of halo per fused 3x3 conv layer (3 layers)
CPAD = 128        # lane-dense channel width for conv / head matmuls
OUT_C = 16        # packed post-process output channels


# --------------------- fused MeanVFE + 3D-backbone stand-in ---------------------

def _vfe_backbone3d_kernel(vox_ref, inv_ref, w_ref, b_ref, o_ref):
    # vox: (N, P*Cpt) zero-padded points; inv: (N, 1) = 1/num_points;
    # w:   (P*Cpt, C3d) = per-point weight tiled P times -> matmul == sum over points.
    s = jnp.dot(vox_ref[...], w_ref[...], preferred_element_type=jnp.float32)
    o_ref[...] = jnp.maximum(s * inv_ref[...] + b_ref[...], 0.0)


def vfe_backbone3d(voxels, num_points, w3d, b3d):
    # voxels: (N, P, Cpt); num_points: (N,)
    N, P, Cpt = voxels.shape
    C3d = w3d.shape[-1]
    inv_n = 1.0 / jnp.maximum(num_points.reshape(N, 1).astype(jnp.float32), 1.0)
    w_tiled = jnp.tile(w3d, (P, 1))                                  # (P*Cpt, C3d)
    # TODO(synk): at real voxel counts this should be tiled over N (grid) for pipelining.
    return pl.pallas_call(
        _vfe_backbone3d_kernel,
        out_shape=jax.ShapeDtypeStruct((N, C3d), jnp.float32),
    )(voxels.reshape(N, P * Cpt), inv_n, w_tiled, b3d.reshape(1, C3d))


# ----------- fused BEV backbone + CenterHead + post-process decode kernel -----------

def _bev_pipeline_kernel(xpad_ref, w1_ref, b1_ref, w2_ref, b2_ref, w3_ref, b3_ref,
                         wh_ref, bh_ref, out_ref, *, th, halo, num_class,
                         voxel_size, pc_range, feat_stride):
    hi = pl.program_id(1)
    wp = xpad_ref.shape[2]
    w_out = wp - 2 * halo

    row0 = pl.multiple_of(hi * th, th)
    x = xpad_ref[0, pl.ds(row0, th + 2 * halo), :, :]                # (th+6, wp, Cbev) bf16

    def conv3x3_relu(x, w_flat_ref, b_ref):
        # im2col: one matmul with K = 9*Cin instead of 9 small-K matmuls.
        r_in, c_in, cin = x.shape
        r_out, c_out = r_in - 2, c_in - 2
        cout = w_flat_ref.shape[-1]
        taps = [x[kh:kh + r_out, kw:kw + c_out, :].reshape(r_out * c_out, cin)
                for kh in range(3) for kw in range(3)]
        patches = jnp.concatenate(taps, axis=-1)                     # (M, 9*cin)
        y = jnp.dot(patches, w_flat_ref[...], preferred_element_type=jnp.float32)
        y = jnp.maximum(y + b_ref[...], 0.0)
        return y.astype(jnp.bfloat16).reshape(r_out, c_out, cout)

    # BaseBEVBackbone (2 conv+BN(folded)+ReLU blocks) + CenterHead shared conv.
    x = conv3x3_relu(x, w1_ref, b1_ref)                              # (th+4, W+4, CPAD)
    x = conv3x3_relu(x, w2_ref, b2_ref)                              # (th+2, W+2, CPAD)
    x = conv3x3_relu(x, w3_ref, b3_ref)                              # (th,   W,   CPAD)

    # CenterHead 1x1 heads (hm, center, center_z, dim, rot) as one lane-padded matmul.
    feats = x.reshape(th * w_out, x.shape[-1])
    preds = jnp.dot(feats, wh_ref[...], preferred_element_type=jnp.float32) + bh_ref[...]

    # post_processing (cls_preds_normalized=False): sigmoid, max over classes, label+1.
    nc = num_class
    hm = preds[:, 0:nc]
    cls_scores = 1.0 / (1.0 + jnp.exp(-hm))
    score = jnp.max(cls_scores, axis=-1, keepdims=True)
    cls_iota = jax.lax.broadcasted_iota(jnp.int32, hm.shape, 1)
    labels = jnp.min(jnp.where(cls_scores >= score, cls_iota, nc),
                     axis=-1, keepdims=True) + 1

    center = preds[:, nc:nc + 2]
    z = preds[:, nc + 2:nc + 3]
    dim = jnp.exp(preds[:, nc + 3:nc + 6])
    rot = preds[:, nc + 6:nc + 8]                                    # (sin, cos)

    ys = jax.lax.broadcasted_iota(jnp.int32, (th, w_out), 0).reshape(th * w_out, 1)
    xs = jax.lax.broadcasted_iota(jnp.int32, (th, w_out), 1).reshape(th * w_out, 1)
    ys = (ys + hi * th).astype(jnp.float32)
    xs = xs.astype(jnp.float32)

    bx = (xs + center[:, 0:1]) * (feat_stride * voxel_size[0]) + pc_range[0]
    by = (ys + center[:, 1:2]) * (feat_stride * voxel_size[1]) + pc_range[1]

    packed = jnp.concatenate(
        [bx, by, z, dim, rot, score, labels.astype(jnp.float32)], axis=-1)   # (M, 10)
    pad = jnp.zeros((packed.shape[0], OUT_C - packed.shape[1]), jnp.float32)
    out_ref[...] = jnp.concatenate([packed, pad], axis=-1).reshape(1, th, w_out, OUT_C)


def _pad_to(a, axis, size):
    pad = [(0, 0)] * a.ndim
    pad[axis] = (0, size - a.shape[axis])
    return jnp.pad(a, pad)


def bev_dense_head(bev, params, num_class, voxel_size, pc_range, feature_map_stride):
    # bev: (B, H, W, Cbev) f32.  One fused pallas_call: conv1 -> conv2 -> shared -> head -> decode.
    B, H, W, Cbev = bev.shape
    TH = 8 if H % 8 == 0 else H
    NH = H // TH

    # Halo-pad once (3 px: one per fused 3x3 layer); bf16 activations, f32 accumulation.
    xpad = jnp.pad(bev, ((0, 0), (HALO, HALO), (HALO, HALO), (0, 0))).astype(jnp.bfloat16)
    Hp, Wp = H + 2 * HALO, W + 2 * HALO

    # Zero-pad channels to 128 lanes (numerics unchanged) and flatten 3x3 taps for im2col.
    w1 = _pad_to(params['w_bev1'], 3, CPAD).reshape(9 * Cbev, CPAD).astype(jnp.bfloat16)
    b1 = _pad_to(params['b_bev1'], 0, CPAD).reshape(1, CPAD)
    w2 = _pad_to(_pad_to(params['w_bev2'], 2, CPAD), 3, CPAD).reshape(9 * CPAD, CPAD).astype(jnp.bfloat16)
    b2 = _pad_to(params['b_bev2'], 0, CPAD).reshape(1, CPAD)
    w3 = _pad_to(_pad_to(params['w_shared'], 2, CPAD), 3, CPAD).reshape(9 * CPAD, CPAD).astype(jnp.bfloat16)
    b3 = _pad_to(params['b_shared'], 0, CPAD).reshape(1, CPAD)
    wh = _pad_to(_pad_to(params['w_head'], 0, CPAD), 1, CPAD).astype(jnp.bfloat16)
    bh = _pad_to(params['b_head'], 0, CPAD).reshape(1, CPAD)

    kernel = functools.partial(
        _bev_pipeline_kernel, th=TH, halo=HALO, num_class=num_class,
        voxel_size=voxel_size, pc_range=pc_range, feat_stride=feature_map_stride)

    return pl.pallas_call(
        kernel,
        grid=(B, NH),
        in_specs=[
            # Full padded plane resident in VMEM; block index is constant over the H-tile
            # axis, so it is DMA'd once per batch element.  (At real BEV sizes this plane
            # should instead be row-tiled with a manual halo DMA to fit v7x's 64 MiB VMEM.)
            pl.BlockSpec((1, Hp, Wp, Cbev), lambda bi, hi: (bi, 0, 0, 0)),
            pl.BlockSpec((9 * Cbev, CPAD), lambda bi, hi: (0, 0)),
            pl.BlockSpec((1, CPAD), lambda bi, hi: (0, 0)),
            pl.BlockSpec((9 * CPAD, CPAD), lambda bi, hi: (0, 0)),
            pl.BlockSpec((1, CPAD), lambda bi, hi: (0, 0)),
            pl.BlockSpec((9 * CPAD, CPAD), lambda bi, hi: (0, 0)),
            pl.BlockSpec((1, CPAD), lambda bi, hi: (0, 0)),
            pl.BlockSpec((CPAD, CPAD), lambda bi, hi: (0, 0)),
            pl.BlockSpec((1, CPAD), lambda bi, hi: (0, 0)),
        ],
        out_specs=pl.BlockSpec((1, TH, W, OUT_C), lambda bi, hi: (bi, hi, 0, 0)),
        out_shape=jax.ShapeDtypeStruct((B, H, W, OUT_C), jnp.float32),
        compiler_params=pltpu.CompilerParams(
            dimension_semantics=("parallel", "parallel")),
    )(xpad, w1, b1, w2, b2, w3, b3, wh, bh)


# ----------------------------- forward wrapper -----------------------------

def centerpoint_3dal_forward(voxels, voxel_num_points, voxel_coords, params,
                             batch_size, grid_size, num_class,
                             voxel_size=(0.4, 0.4), pc_range=(-3.2, -3.2),
                             feature_map_stride=1.0):
    D, H, W = grid_size
    B = batch_size
    _, Nv, P, Cpt = voxels.shape

    # --- MeanVFE + 3D backbone stand-in (fused; mean folded into the pointwise linear) ---
    vfeat = vfe_backbone3d(voxels.reshape(B * Nv, P, Cpt),
                           voxel_num_points.reshape(B * Nv),
                           params['w3d'], params['b3d'])             # (B*Nv, C3d)
    C3d = vfeat.shape[-1]

    # --- map_to_bev (HeightCompression) ---
    # TODO(synk): data-dependent scatter kept in plain JAX; writes straight into the
    #             channel-packed NHWC layout (channel = c*D + d), avoiding the transpose pass.
    flat_coords = voxel_coords.reshape(B * Nv, 3)
    zc, yc, xc = flat_coords[:, 0], flat_coords[:, 1], flat_coords[:, 2]
    b_idx = jnp.repeat(jnp.arange(B), Nv)
    ch_idx = zc[:, None] + jnp.arange(C3d)[None, :] * D              # (N, C3d)
    bev = jnp.zeros((B, H, W, C3d * D), jnp.float32)
    bev = bev.at[b_idx[:, None], yc[:, None], xc[:, None], ch_idx].set(vfeat)

    # --- Backbone2D + CenterHead + box decode: one fused Pallas kernel ---
    out = bev_dense_head(bev, params, num_class, voxel_size, pc_range, feature_map_stride)
    flat = out.reshape(B, H * W, OUT_C)

    # arctan2 of (sin, cos) kept as cheap XLA glue (Mosaic atan2 lowering not guaranteed).
    heading = jnp.arctan2(flat[..., 6:7], flat[..., 7:8])
    boxes = jnp.concatenate([flat[..., 0:6], heading], axis=-1)      # (B, H*W, 7)
    scores = flat[..., 8]
    labels = flat[..., 9].astype(jnp.int32)

    # TODO(synk): class_agnostic_nms / score-threshold selection and generate_recall_record
    #             (IoU3D) have no clean Pallas equivalent; returning dense decoded outputs.
    pred_dicts = [{'pred_boxes': boxes[i], 'pred_scores': scores[i],
                   'pred_labels': labels[i]} for i in range(B)]
    recall_dict = {}
    return pred_dicts, recall_dict


# ----------------------------- main -----------------------------

if __name__ == "__main__":
    key = jax.random.PRNGKey(0)
    B, Nv, P, Cpt = 2, 32, 8, 4             # batch, voxels/batch, max points/voxel, point feats
    D, H, W = 4, 16, 16                     # voxel grid (depth, height, width)
    num_class = 3
    C3d, Cmid = 8, 64                       # logical channel widths (padded to 128 internally)
    Cbev = C3d * D                          # BEV channels after HeightCompression
    Chead = num_class + 2 + 1 + 3 + 2       # hm + center + center_z + dim + rot

    keys = jax.random.split(key, 16)
    voxels = jax.random.normal(keys[0], (B, Nv, P, Cpt), jnp.float32)
    num_pts = jax.random.randint(keys[1], (B, Nv), 1, P + 1)
    # zero out padded points, as the voxelizer does
    pt_mask = (jnp.arange(P)[None, None, :] < num_pts[..., None]).astype(jnp.float32)
    voxels = voxels * pt_mask[..., None]
    zc = jax.random.randint(keys[2], (B, Nv), 0, D)
    yc = jax.random.randint(keys[3], (B, Nv), 0, H)
    xc = jax.random.randint(keys[4], (B, Nv), 0, W)
    coords = jnp.stack([zc, yc, xc], axis=-1)

    def init(k, shape, scale=0.1):
        return scale * jax.random.normal(k, shape, jnp.float32)

    params = {
        'w3d': init(keys[5], (Cpt, C3d)), 'b3d': init(keys[6], (C3d,)),
        'w_bev1': init(keys[7], (3, 3, Cbev, Cmid)), 'b_bev1': init(keys[8], (Cmid,)),
        'w_bev2': init(keys[9], (3, 3, Cmid, Cmid)), 'b_bev2': init(keys[10], (Cmid,)),
        'w_shared': init(keys[11], (3, 3, Cmid, Cmid)), 'b_shared': init(keys[12], (Cmid,)),
        'w_head': init(keys[13], (Cmid, Chead)), 'b_head': init(keys[14], (Chead,)),
    }

    pred_dicts, recall_dict = centerpoint_3dal_forward(
        voxels, num_pts, coords, params, B, (D, H, W), num_class)
    jax.block_until_ready(pred_dicts[0]['pred_boxes'])
    jax.block_until_ready(pred_dicts[0]['pred_scores'])
    jax.block_until_ready(pred_dicts[0]['pred_labels'])
    print("KERNEL_OK")
</pallas_src>

<mosaic_0001>
module attributes {stable_mosaic.version = 11 : i64} {
  func.func @_vfe_backbone3d_kernel(%arg0: memref<64x32xf32, #tpu.memory_space<vmem>>, %arg1: memref<64x1xf32, #tpu.memory_space<vmem>>, %arg2: memref<32x8xf32, #tpu.memory_space<vmem>>, %arg3: memref<1x8xf32, #tpu.memory_space<vmem>>, %arg4: memref<64x8xf32, #tpu.memory_space<vmem>>) attributes {dimension_semantics = [], scalar_prefetch = 0 : i64, scratch_operands = 0 : i64, tpu.core_type = #tpu.core_type<tc>} {
    %c0 = arith.constant 0 : index
    %c0_0 = arith.constant 0 : index
    %0 = vector.load %arg0[%c0, %c0_0] : memref<64x32xf32, #tpu.memory_space<vmem>>, vector<64x32xf32>
    %c0_1 = arith.constant 0 : index
    %c0_2 = arith.constant 0 : index
    %1 = vector.load %arg2[%c0_1, %c0_2] : memref<32x8xf32, #tpu.memory_space<vmem>>, vector<32x8xf32>
    %cst = arith.constant dense<0.000000e+00> : vector<64x8xf32>
    %2 = tpu.matmul %0, %1, %cst {dimension_numbers = #tpu.dot_dimension_numbers<[1], [0], [0], [1], [0, 0, 1, 1], [], []>} : vector<64x32xf32>, vector<32x8xf32>, vector<64x8xf32> -> vector<64x8xf32>
    %c0_3 = arith.constant 0 : index
    %c0_4 = arith.constant 0 : index
    %3 = vector.load %arg1[%c0_3, %c0_4] : memref<64x1xf32, #tpu.memory_space<vmem>>, vector<64x1xf32>
    %4 = vector.broadcast %3 : vector<64x1xf32> to vector<64x8xf32>
    %5 = arith.mulf %2, %4 : vector<64x8xf32>
    %c0_5 = arith.constant 0 : index
    %c0_6 = arith.constant 0 : index
    %6 = vector.load %arg3[%c0_5, %c0_6] : memref<1x8xf32, #tpu.memory_space<vmem>>, vector<1x8xf32>
    %7 = vector.broadcast %6 : vector<1x8xf32> to vector<64x8xf32>
    %8 = arith.addf %5, %7 : vector<64x8xf32>
    %cst_7 = arith.constant 0.000000e+00 : f32
    %9 = vector.broadcast %cst_7 : f32 to vector<64x8xf32>
    %10 = arith.maximumf %8, %9 : vector<64x8xf32>
    %c0_8 = arith.constant 0 : index
    %c0_9 = arith.constant 0 : index
    %11 = vector.load %arg4[%c0_8, %c0_9] : memref<64x8xf32, #tpu.memory_space<vmem>>, vector<64x8xf32>
    tpu.vector_store %arg4[%c0_8, %c0_9], %10 {strides = array<i32>} : memref<64x8xf32, #tpu.memory_space<vmem>>, vector<64x8xf32>,
    return
  }
}

</mosaic_0001>

<bundles_post_ra>
// kernel: tpu_custom_call.1
= control target key start
LH: loop header
LB: loop body
LE: loop exit
PB: predicated region body
PF: predicated region fallthrough
CT: control target
= control target key end

     0   :  { %v303_v2 = vmov 0   ;;  %vm29_vm0 = vcmask 261120   ;;  %vm238_vm1 = vcmask 64512   ;;  %s432_s2 = inlined_call_operand.vmem [shape: f32[32,8], index: 2, kind: input, shape index: {}]   ;;  %s433_s0 = inlined_call_operand.vmem [shape: f32[64,32], index: 0, kind: input, shape index: {}]   ;;  %s434_s1 = inlined_call_operand.vmem [shape: f32[64,1], index: 1, kind: input, shape index: {}]   ;;  %s435_s3 = inlined_call_operand.vmem [shape: f32[1,8], index: 3, kind: input, shape index: {}]   ;;  %s436_s4 = inlined_call_operand.vmem [shape: f32[64,8], index: 4, kind: output, shape index: {}]  }
   0x1   :  { %v28_v0 = vld [vmem:[%s432_s2 + $0x18] sm:$0xff]  ;;  %v27_v1 = vld [vmem:[%s432_s2 + $0x10] sm:$0xff]  ;;  %302 = vset.pattern.permute.xlu1 %v303_v2  ;;  %301 = vset.pattern.permute.xlu0 %v303_v2  ;;  %v26_v3 = vld [vmem:[%s432_s2 + $0x8] sm:$0xff] }
   0x2   :  { %272 = vmatprep.subr.mxu0 %v28_v0  ;;  %292 = vmatprep.subr.mxu1 %v28_v0  ;;  %v25_v4 = vld [vmem:[%s432_s2] sm:$0xff]  ;;  %v18_v7 = vld [vmem:[%s433_s0 + $0x8] sm:$0xff]  ;;  %v19_v9 = vld [vmem:[%s433_s0 + $0x10] sm:$0xff] }
   0x3   :  { %273 = vmatpush3.msra.mxu0 %v28_v0  ;;  %296 = vmatpush3.msra.mxu1 %v28_v0  ;;  %v17_v5 = vld [vmem:[%s433_s0] sm:$0xff]  ;;  %v22_v8 = vld [vmem:[%s433_s0 + $0x28] sm:$0xff]  ;;  %v23_v10 = vld [vmem:[%s433_s0 + $0x30] sm:$0xff] }
   0x4   :  { %274 = vmatprep.subr.mxu0 %v27_v1  ;;  %293 = vmatprep.subr.mxu1 %v27_v1  ;;  %v21_v6 = vld [vmem:[%s433_s0 + $0x20] sm:$0xff]  ;;  %v161_v11 = vld [vmem:[%s434_s1 + $0x10] sm:$0xff]  ;;  %v20_v13 = vld [vmem:[%s433_s0 + $0x18] sm:$0xff] }
   0x5   :  { %275 = vmatpush3.msra.mxu0 %v27_v1  ;;  %297 = vmatpush3.msra.mxu1 %v27_v1  ;;  %v159_v12 = vld [vmem:[%s434_s1] sm:$0xff]  ;;  %v24_v14 = vld [vmem:[%s433_s0 + $0x38] sm:$0xff]  ;;  %v160_v16 = vld [vmem:[%s434_s1 + $0x8] sm:$0xff] }
   0x6   :  { %276 = vmatprep.subr.mxu0 %v26_v3  ;;  %294 = vmatprep.subr.mxu1 %v26_v3  ;;  %v162_v15 = vld [vmem:[%s434_s1 + $0x18] sm:$0xff]  ;;  %v164_v17 = vld [vmem:[%s434_s1 + $0x28] sm:$0xff]  ;;  %v163_v18 = vld [vmem:[%s434_s1 + $0x20] sm:$0xff] }
   0x7   :  { %277 = vmatpush3.msra.mxu0 %v26_v3  ;;  %298 = vmatpush3.msra.mxu1 %v26_v3  ;;  %v166_v19 = vld [vmem:[%s434_s1 + $0x38] sm:$0xff]  ;;  %v165_v20 = vld [vmem:[%s434_s1 + $0x30] sm:$0xff]  ;;  %v259_v28 = vld [vmem:[%s435_s3] ss:$0 sm:$0xff] }
   0x8   :  { %278 = vmatprep.subr.mxu0 %v25_v4  ;;  %295 = vmatprep.subr.mxu1 %v25_v4 }
   0x9   :  { %279 = vmatpush3.msra.mxu0 %v25_v4  ;;  %299 = vmatpush3.msra.mxu1 %v25_v4 }
   0xa   :  { %280 = vmatprep.mubr.msk.f32.mxu0 %vm29_vm0, %v17_v5  ;;  %286 = vmatprep.mubr.msk.f32.mxu1 %vm29_vm0, %v21_v6 }
   0xb   :  { %281 = vmatmul.mubr.msk.f32.vlgmr.msra.gmra.mxu0 %vm29_vm0, %v18_v7  ;;  %287 = vmatmul.mubr.msk.f32.vlgmr.msra.gmra.mxu1 %vm29_vm0, %v22_v8 }
   0xc   :  { %283 = vmatprep.mubr.msk.f32.mxu0 %vm29_vm0, %v19_v9  ;;  %289 = vmatprep.mubr.msk.f32.mxu1 %vm29_vm0, %v23_v10 }
   0xd   :  { %179 = vperm.xlu1 %302, %v161_v11   ;;  %169 = vperm.xlu0 %301, %v159_v12  }
   0xf   :  { %284 = vmatmul.mubr.msk.f32.gmra.mxu0 %vm29_vm0, %v20_v13  ;;  %290 = vmatmul.mubr.msk.f32.gmra.mxu1 %vm29_vm0, %v24_v14 }
  0x11   :  { %184 = vperm.xlu1 %302, %v162_v15   ;;  %174 = vperm.xlu0 %301, %v160_v16  }
  0x15   :  { %194 = vperm.xlu1 %302, %v164_v17   ;;  %189 = vperm.xlu0 %301, %v163_v18  }
  0x19   :  { %204 = vperm.xlu1 %302, %v166_v19   ;;  %199 = vperm.xlu0 %301, %v165_v20  }
  0x88   :  { %v180_v21 = vpop.permute.xlu1 %179  ;;  %v170_v22 = vpop.permute.xlu0 %169 }
  0x8c   :  { %v185_v23 = vpop.permute.xlu1 %184  ;;  %v175_v24 = vpop.permute.xlu0 %174 }
  0x90   :  { %v195_v25 = vpop.permute.xlu1 %194  ;;  %v190_v26 = vpop.permute.xlu0 %189 }
  0x94   :  { %v205_v40 = vpop.permute.xlu1 %204  ;;  %v200_v41 = vpop.permute.xlu0 %199 }
  0xcb   :  { %v282_v27 = vpop.f32.mrf.mxu0  ;;  %v288_v29 = vpop.f32.mrf.mxu1 }
  0xcc   :  { %v208_v30 = vmul.f32 %v282_v27, %v175_v24  ;;  %v212_v31 = vmul.f32 %v288_v29, %v195_v25 }
  0xcd   :  { %v120_v32 = vpop.f32.mrf.mxu0  ;;  %v140_v33 = vpop.f32.mrf.mxu1 }
  0xce   :  { %v223_v34 = vadd.f32 %v259_v28, %v208_v30  ;;  %v227_v35 = vadd.f32 %v259_v28, %v212_v31  ;;  %v207_v36 = vmul.f32 %v170_v22, %v120_v32  ;;  %v211_v37 = vmul.f32 %v190_v26, %v140_v33 }
  0xcf   :  { %v285_v38 = vpop.f32.mrf.mxu0  ;;  %v291_v39 = vpop.f32.mrf.mxu1 }
  0xd0   :  { %v231_v42 = vmax.f32 %v223_v34, 0.0  ;;  %v235_v43 = vmax.f32 %v227_v35, 0.0  ;;  %v222_v44 = vadd.f32 %v259_v28, %v207_v36  ;;  %v226_v45 = vadd.f32 %v259_v28, %v211_v37 }
  0xd1   :  { %v210_v46 = vmul.f32 %v285_v38, %v185_v23  ;;  %v214_v47 = vmul.f32 %v291_v39, %v205_v40  ;;  %v130_v48 = vpop.f32.mrf.mxu0  ;;  %v150_v49 = vpop.f32.mrf.mxu1 }
  0xd2   :  { %240 = vst.msk [vmem:[%s436_s4 + $0x8] sm:$0xff] %vm238_vm1, %v231_v42  ;;  %244 = vst.msk [vmem:[%s436_s4 + $0x28] sm:$0xff] %vm238_vm1, %v235_v43  ;;  %v230_v50 = vmax.f32 %v222_v44, 0.0  ;;  %v234_v51 = vmax.f32 %v226_v45, 0.0  ;;  %v209_v52 = vmul.f32 %v180_v21, %v130_v48  ;;  %v213_v53 = vmul.f32 %v200_v41, %v150_v49 }
  0xd3   :  { %v225_v54 = vadd.f32 %v259_v28, %v210_v46  ;;  %v229_v55 = vadd.f32 %v259_v28, %v214_v47 }
  0xd4   :  { %239 = vst.msk [vmem:[%s436_s4] sm:$0xff] %vm238_vm1, %v230_v50  ;;  %243 = vst.msk [vmem:[%s436_s4 + $0x20] sm:$0xff] %vm238_vm1, %v234_v51  ;;  %v224_v56 = vadd.f32 %v259_v28, %v209_v52  ;;  %v228_v57 = vadd.f32 %v259_v28, %v213_v53 }
  0xd5   :  { %v233_v58 = vmax.f32 %v225_v54, 0.0  ;;  %v237_v59 = vmax.f32 %v229_v55, 0.0 }
  0xd6   :  { %v232_v60 = vmax.f32 %v224_v56, 0.0  ;;  %v236_v61 = vmax.f32 %v228_v57, 0.0 }
  0xd7   :  { %242 = vst.msk [vmem:[%s436_s4 + $0x18] sm:$0xff] %vm238_vm1, %v233_v58  ;;  %246 = vst.msk [vmem:[%s436_s4 + $0x38] sm:$0xff] %vm238_vm1, %v237_v59 }
  0xd8   :  { %241 = vst.msk [vmem:[%s436_s4 + $0x10] sm:$0xff] %vm238_vm1, %v232_v60  ;;  %245 = vst.msk [vmem:[%s436_s4 + $0x30] sm:$0xff] %vm238_vm1, %v236_v61 }

</bundles_post_ra>
